<compile_context>
chip_gen: v6e
topology: v6e:2x2x1
jax: 0.10.0
libtpu: 0.0.40
codegen_flags: <defaults>
</compile_context>

<pallas_src>
import functools

import jax
import jax.numpy as jnp
from jax.experimental import pallas as pl
from jax.experimental.pallas import tpu as pltpu


def _round_up(n, m):
    return ((n + m - 1) // m) * m


def _tpu_vmem_and_cores():
    """Best-effort trace-time HW query: (VMEM capacity bytes, #TensorCores)."""
    cap, cores = 64 << 20, None          # conservative defaults (v7x-sized VMEM)
    try:
        info = pltpu.get_tpu_info()
        c = getattr(info, "vmem_capacity_bytes", None)
        if c:
            cap = int(c)
        for name in ("num_tensorcores", "tensorcore_count", "num_cores",
                     "core_count"):
            v = getattr(info, name, None)
            if v:
                cores = int(v)
                break
    except Exception:
        pass
    if cores is None:
        # Heuristic: 64 MiB-per-core VMEM chips (v7x) have 2 TCs/chip.
        cores = 2 if cap <= (64 << 20) else 1
    return cap, cores


def _classifier_kernel(x_ref, w_ref, b_ref, o_ref):
    # z = x @ W_pad + b ; out = sigmoid(z)
    # x cast to bf16 in-kernel (no separate wrapper astype pass over HBM),
    # f32 accumulation on the MXU, sigmoid via EUP exp + approx reciprocal.
    x = x_ref[...].astype(jnp.bfloat16)
    z = jnp.dot(x, w_ref[...], preferred_element_type=jnp.float32)
    z = z + b_ref[...]                          # (bm, tn) + (1, tn)
    z = jnp.clip(z, -30.0, 30.0)                # keep exp finite (no inf/NaN)
    e = jnp.exp(-z)                             # EUP
    o_ref[...] = pl.reciprocal(1.0 + e, approx=True).astype(o_ref.dtype)  # EUP


def prepare_params(w, b):
    """One-time parameter prep (hoisted out of the per-call forward):
    transpose nn.Linear weight (n_class, dim) -> (dim, n_pad) with the class
    axis zero-padded to a 128-lane multiple, weight cast to bf16."""
    n_class, dim = w.shape
    n_pad = _round_up(n_class, 128)
    w_p = jnp.zeros((dim, n_pad), jnp.bfloat16).at[:, :n_class].set(
        jnp.asarray(w).T.astype(jnp.bfloat16))
    b_p = jnp.zeros((1, n_pad), jnp.float32).at[:, :n_class].set(
        jnp.asarray(b, jnp.float32).reshape(1, n_class))
    return w_p, b_p


@functools.partial(
    jax.jit,
    static_argnames=("dim", "n_class", "block_m", "out_dtype", "trim"))
def img_classifier_forward(x, w_p, b_p, *, dim, n_class, block_m=None,
                           out_dtype=jnp.float32, trim=True):
    """Pallas implementation of img_classifier.forward (use_bn=False).

    x    : any shape whose total size is divisible by `dim` (torch .view(-1, dim))
    w_p  : (dim, n_pad)  pre-padded, pre-transposed bf16 weight (prepare_params)
    b_p  : (1, n_pad)    pre-padded f32 bias (prepare_params)
    """
    x2 = x.reshape(-1, dim)                  # keep source dtype; cast in-kernel
    B = x2.shape[0]
    n_pad = w_p.shape[1]

    vmem_cap, n_tc = _tpu_vmem_and_cores()
    budget = vmem_cap - (8 << 20)            # leave compiler-scratch headroom

    if block_m is None:
        block_m = 1024 if vmem_cap >= (100 << 20) else 512   # v5e/v6e vs v7x

    # Batch tile: large (up to block_m), multiple of 16 (bf16 sublane packing);
    # only force >=2 grid steps on multi-TC chips so both cores get work.
    bm = max(16, min(block_m, _round_up(pl.cdiv(B, n_tc), 16)))
    grid_m = pl.cdiv(B, bm)                  # ragged last block is store-masked

    x_bytes = jnp.dtype(x2.dtype).itemsize
    o_bytes = jnp.dtype(out_dtype).itemsize

    def footprint(tn, w_bufs):
        return (2 * bm * dim * x_bytes       # x tiles (double buffered)
                + 2 * bm * tn * o_bytes      # out tiles (double buffered)
                + w_bufs * dim * tn * 2      # bf16 weight
                + w_bufs * tn * 4            # f32 bias
                + (4 << 20))                 # slack

    # Keep the weight fully resident (single buffer) when it fits the budget;
    # otherwise tile the class axis so very large heads still work on v7x.
    tn = n_pad
    while tn > 128 and footprint(tn, 1 if tn == n_pad else 2) > budget:
        tn = max(128, _round_up(tn // 2, 128))
    grid_n = pl.cdiv(n_pad, tn)
    resident = grid_n == 1

    vmem_bytes = int(min(max(footprint(tn, 1 if resident else 2), 32 << 20),
                         budget))

    if resident:
        # Constant index_map -> a second pipeline buffer is pure VMEM waste.
        w_spec = pl.BlockSpec((dim, tn), lambda i, j: (0, j),
                              pipeline_mode=pl.Buffered(1))
        b_spec = pl.BlockSpec((1, tn), lambda i, j: (0, j),
                              pipeline_mode=pl.Buffered(1))
    else:
        w_spec = pl.BlockSpec((dim, tn), lambda i, j: (0, j))
        b_spec = pl.BlockSpec((1, tn), lambda i, j: (0, j))

    out = pl.pallas_call(
        _classifier_kernel,
        out_shape=jax.ShapeDtypeStruct((B, n_pad), out_dtype),
        grid_spec=pltpu.PrefetchScalarGridSpec(
            num_scalar_prefetch=0,
            grid=(grid_m, grid_n),
            in_specs=[
                pl.BlockSpec((bm, dim), lambda i, j: (i, 0)),   # x batch tile
                w_spec,                                         # weight tile
                b_spec,                                         # bias tile
            ],
            out_specs=pl.BlockSpec((bm, tn), lambda i, j: (i, j)),
        ),
        compiler_params=pltpu.CompilerParams(
            dimension_semantics=("parallel", "parallel"),
            vmem_limit_bytes=vmem_bytes,
        ),
    )(x2, w_p, b_p)

    if trim:
        out = out[:, :n_class]   # drop padded class lanes (skip via trim=False)
    return out


def init_params(key, dim, n_class):
    """weights_init_classifier for nn.Linear: W ~ U(-0.1, 0.1), bias = 0."""
    w = jax.random.uniform(key, (n_class, dim), jnp.float32,
                           minval=-0.1, maxval=0.1)
    b = jnp.zeros((n_class,), jnp.float32)
    return w, b


if __name__ == "__main__":
    dim = 32
    n_class = 10

    key = jax.random.PRNGKey(0)
    k_x, k_w = jax.random.split(key)

    # Input whose flattened rows give (-1, dim): (5, 4, 32) -> (20, 32)
    x = jax.random.normal(k_x, (5, 4, dim), jnp.float32)
    w, b = init_params(k_w, dim, n_class)
    w_p, b_p = prepare_params(w, b)          # one-time padded/bf16 param prep

    # Default path: f32 output, trimmed to n_class (exact module semantics).
    out = img_classifier_forward(x, w_p, b_p, dim=dim, n_class=n_class)
    out = jax.block_until_ready(out)

    # Reference with the same bf16 rounding the kernel applies to x and W.
    x2_ref = x.reshape(-1, dim).astype(jnp.bfloat16).astype(jnp.float32)
    w_ref = w_p[:, :n_class].astype(jnp.float32)
    ref = jax.nn.sigmoid(x2_ref @ w_ref + b[None, :])

    assert out.shape == (20, n_class)
    assert out.dtype == jnp.float32
    assert jnp.allclose(out, ref, atol=5e-3, rtol=5e-3)

    # Fast path: bf16 padded output (halved HBM writes, no wrapper slice copy).
    out_bf = img_classifier_forward(x, w_p, b_p, dim=dim, n_class=n_class,
                                    out_dtype=jnp.bfloat16, trim=False)
    out_bf = jax.block_until_ready(out_bf)
    assert out_bf.shape == (20, w_p.shape[1]) and out_bf.dtype == jnp.bfloat16
    assert jnp.allclose(out_bf[:, :n_class].astype(jnp.float32), ref,
                        atol=2e-2, rtol=2e-2)

    print("KERNEL_OK")
</pallas_src>

<mosaic_0001>
module attributes {stable_mosaic.version = 11 : i64} {
  func.func @_classifier_kernel(%arg0: i32, %arg1: i32, %arg2: memref<16x32xf32, #tpu.memory_space<vmem>>, %arg3: memref<32x128xbf16, #tpu.memory_space<vmem>>, %arg4: memref<1x128xf32, #tpu.memory_space<vmem>>, %arg5: memref<16x128xf32, #tpu.memory_space<vmem>>) attributes {dimension_semantics = [#tpu.dimension_semantics<parallel>, #tpu.dimension_semantics<parallel>], iteration_bounds = array<i64: 2, 1>, scalar_prefetch = 0 : i64, scratch_operands = 0 : i64, tpu.core_type = #tpu.core_type<tc>, window_params = [{transform_indices = @transform_0, window_bounds = array<i64: 16, 32>}, {pipeline_mode = #tpu.pipeline_mode<synchronous>, transform_indices = @transform_1, window_bounds = array<i64: 32, 128>}, {pipeline_mode = #tpu.pipeline_mode<synchronous>, transform_indices = @transform_2, window_bounds = array<i64: 1, 128>}, {transform_indices = @transform_3, window_bounds = array<i64: 16, 128>}]} {
    %c0 = arith.constant 0 : index
    %c0_0 = arith.constant 0 : index
    %0 = vector.load %arg2[%c0, %c0_0] : memref<16x32xf32, #tpu.memory_space<vmem>>, vector<16x32xf32>
    %1 = arith.truncf %0 : vector<16x32xf32> to vector<16x32xbf16>
    %c0_1 = arith.constant 0 : index
    %c0_2 = arith.constant 0 : index
    %2 = vector.load %arg3[%c0_1, %c0_2] : memref<32x128xbf16, #tpu.memory_space<vmem>>, vector<32x128xbf16>
    %cst = arith.constant dense<0.000000e+00> : vector<16x128xf32>
    %3 = tpu.matmul %1, %2, %cst {dimension_numbers = #tpu.dot_dimension_numbers<[1], [0], [0], [1], [0, 0, 1, 1], [], []>} : vector<16x32xbf16>, vector<32x128xbf16>, vector<16x128xf32> -> vector<16x128xf32>
    %c0_3 = arith.constant 0 : index
    %c0_4 = arith.constant 0 : index
    %4 = vector.load %arg4[%c0_3, %c0_4] : memref<1x128xf32, #tpu.memory_space<vmem>>, vector<1x128xf32>
    %5 = vector.broadcast %4 : vector<1x128xf32> to vector<16x128xf32>
    %6 = arith.addf %3, %5 : vector<16x128xf32>
    %cst_5 = arith.constant -3.000000e+01 : f32
    %cst_6 = arith.constant 3.000000e+01 : f32
    %7 = vector.broadcast %cst_5 : f32 to vector<16x128xf32>
    %8 = arith.maximumf %7, %6 : vector<16x128xf32>
    %9 = vector.broadcast %cst_6 : f32 to vector<16x128xf32>
    %10 = arith.minimumf %9, %8 : vector<16x128xf32>
    %cst_7 = arith.constant 0.000000e+00 : f32
    %11 = vector.broadcast %cst_7 : f32 to vector<16x128xf32>
    %12 = arith.subf %11, %10 : vector<16x128xf32>
    %13 = math.exp %12 : vector<16x128xf32>
    %cst_8 = arith.constant 1.000000e+00 : f32
    %14 = vector.broadcast %cst_8 : f32 to vector<16x128xf32>
    %15 = arith.addf %14, %13 : vector<16x128xf32>
    %16 = tpu.reciprocal %15 {approx = true} : vector<16x128xf32> -> vector<16x128xf32>
    %c0_9 = arith.constant 0 : index
    %c0_10 = arith.constant 0 : index
    %17 = vector.load %arg5[%c0_9, %c0_10] : memref<16x128xf32, #tpu.memory_space<vmem>>, vector<16x128xf32>
    tpu.vector_store %arg5[%c0_9, %c0_10], %16 {strides = array<i32>} : memref<16x128xf32, #tpu.memory_space<vmem>>, vector<16x128xf32>,
    return
  }
  func.func @transform_0(%arg0: i32, %arg1: i32) -> (i32, i32) {
    %c0_i32 = arith.constant 0 : i32
    %c0_i32_0 = arith.constant 0 : i32
    return %arg0, %c0_i32 : i32, i32
  }
  func.func @transform_1(%arg0: i32, %arg1: i32) -> (i32, i32) {
    %c0_i32 = arith.constant 0 : i32
    %c0_i32_0 = arith.constant 0 : i32
    return %c0_i32, %arg1 : i32, i32
  }
  func.func @transform_2(%arg0: i32, %arg1: i32) -> (i32, i32) {
    %c0_i32 = arith.constant 0 : i32
    %c0_i32_0 = arith.constant 0 : i32
    return %c0_i32, %arg1 : i32, i32
  }
  func.func @transform_3(%arg0: i32, %arg1: i32) -> (i32, i32) {
    %c0_i32 = arith.constant 0 : i32
    return %arg0, %arg1 : i32, i32
  }
}

</mosaic_0001>

<bundles_post_ra>
// kernel: img_classifier_forward.1
= control target key start
LH: loop header
LB: loop body
LE: loop exit
PB: predicated region body
PF: predicated region fallthrough
CT: control target
= control target key end

     0   :  { %s872_s12 = smov 0   ;;  %s874_s13 = smov 0   ;;  %s983_s0 = inlined_call_operand.vmem [shape: f32[20,32], index: 0, kind: input, shape index: {}]   ;;  %s984_s1 = inlined_call_operand.vmem [shape: bf16[32,128], index: 1, kind: input, shape index: {}]   ;;  %s985_s2 = inlined_call_operand.vmem [shape: f32[1,128], index: 2, kind: input, shape index: {}]   ;;  %s986_s3 = inlined_call_operand.vmem [shape: f32[20,128], index: 3, kind: output, shape index: {}]  }
   0x1   :  { %s876_s14 = smov 0   ;;  %s878_s15 = smov 0  }
   0x2   :  { %s880_s16 = smov 0  }
   0x3 LB: > { %s583_s17 = sadd.s32 4294967295, %s816_s16   ;;  %s25_s18 = sadd.s32 1, %s812_s15  ;;  %s816_s16 = sphi %s880_s16, %s13_s16   ;;  %s812_s15 = sphi %s878_s15, %s991_s15   ;;  %s808_s14 = sphi %s876_s14, %s990_s14   ;;  %s804_s13 = sphi %s874_s13, %s989_s13   ;;  %s800_s12 = sphi %s872_s12, %s988_s12  }
   0x4   : > { %p27_p0 = scmp.ge.s32.totalorder %s25_s18, 2  ;;  %s112_s19 = sadd.s32 1, %s804_s13 }
   0x5   : > { %p122_p1 = scmp.ne.s32.totalorder %s804_s13, %s800_s12  ;;  %p123_p2 = scmp.eq.s32.totalorder %s583_s17, 1 }
   0x6   : > { %s993_s18 = smov (%p27_p0, %s25_s18), 0  ;;  %p589_p4 = scmp.ge.s32.totalorder %s816_s16, 1 }
   0x7   : > { %p904_p3 = por %p123_p2, %p122_p1  ;;  %s107_s21 = ssub.s32 %s812_s15, %s993_s18 }
   0x8   : > { %p177_p5 = scmp.lt.s32.totalorder %s816_s16, 3  ;;  %p110_p6 = scmp.eq.s32.totalorder %s107_s21, 0 }
   0xa   : > { %p178_p7 = pnand %p589_p4, %p177_p5 }
   0xb   : > { %s913_s22 = scalar_select %p110_p6, %s804_s13, %s112_s19  }
   0xc   : > { %181 = sbr.rel (%p178_p7) target bundleno = 301 (0x12d), region = 32  ;;  %s922_s27 = sshll.u32 (!%p178_p7), %s808_s14, 1 }
   0xd   : > { %p216_p8 = scmp.lt.s32.totalorder (!%p178_p7), %s922_s27, 2  ;;  %s208_s8 = sand.u32 (!%p178_p7), 1, %s800_s12  }
   0xe   : > { %s590_s9 = sshll.u32 (!%p178_p7), %s208_s8, 4 }
   0xf   : > { %s933_s10 = scalar_lea.vmem (!%p178_p7), [#allocation2], %s590_s9  }
  0x11   : > { %v736_v0 = vld [vmem:[%s984_s1 + $0x8] sm:$0xff]   ;;  %v850_v1 = vmov 0.0   ;;  %v737_v2 = vld [vmem:[%s984_s1] sm:$0xff]   ;;  %vm851_vm0 = vmmov 0   ;;  %s217_s28 = scalar_select %p216_p8, %s922_s27, 2  ;;  %vm264_vm1 = vcmask 261120  }
  0x12   : > { %622 = vmatprep.subr.bf16.mxu0 %v850_v1  ;;  %626 = vmatprep.mubr.msk.bf16.mxu0 %vm851_vm0, %v850_v1  ;;  %v593_v6 = vld [vmem:[%s985_s2] ss:$0 sm:$0xff]  ;;  %s333_s11 = ssub.s32 (%p904_p3), 3, %s922_s27  ;;  %s616_s17 = sshll.u32 (%p904_p3), %s808_s14, 4 }
  0x13   : > { %623 = vmatpush3.bf16.msra.mxu0 %v736_v0  ;;  %s592_s29 = sshll.u32 %s217_s28, 3  ;;  %p334_p9 = scmp.lt.s32.totalorder (%p904_p3), %s333_s11, 2 }
  0x14   : > { %624 = vmatprep.subr.bf16.mxu0 %v850_v1  ;;  %s219_s5 = scalar_lea.vmem %s983_s0, %s592_s29  ;;  %s944_s12 = scalar_lea.vmem (%p904_p3), %s986_s3, %s616_s17  }
  0x15   : > { %v238_v3 = vld [vmem:[%s219_s5] sm:$0xff]  ;;  %v239_v4 = vld [vmem:[%s219_s5 + $0x8] sm:$0xff] }
  0x16   : > { %v240_v5 = vpack.c.bf16 %v239_v4, %v238_v3 }
  0x17   : > { %625 = vmatpush3.bf16.msra.mxu0 %v737_v2 }
  0x1a   : > { %627 = vmatmul.mubr.msk.bf16.vlgmr.msra.gmra.mxu0 %vm264_vm1, %v240_v5 }
  0xda   : > { %v302_v7 = vpop.f32.mrf.mxu0 }
  0xdb   : > { %v303_v8 = vadd.f32 %v593_v6, %v302_v7 }
  0xdc   : > { %v628_v9 = vpop.f32.mrf.mxu0 }
  0xdd   : > { %v597_v10 = vclamps-f32 %v303_v8, 30.0 }
  0xde   : > { %v305_v11 = vpop.f32.mrf.mxu0 }
  0xdf   : > { %v313_v12 = vsub.f32 0.0, %v597_v10  ;;  %v306_v13 = vadd.f32 %v593_v6, %v305_v11 }
  0xe0   : > { %v629_v14 = vpop.f32.mrf.mxu0 }
  0xe1   : > { %v315_v15 = vmul.f32 1.442695, %v313_v12  ;;  %v598_v16 = vclamps-f32 %v306_v13, 30.0 }
  0xe3   : > { %738 = vpow2.f32 %v315_v15  ;;  %v314_v17 = vsub.f32 0.0, %v598_v16 }
  0xe5   : > { %v317_v18 = vmul.f32 1.442695, %v314_v17 }
  0xe7   : > { %740 = vpow2.f32 %v317_v18 }
  0xf0   : > { %v739_v19 = vpop.eup %738 }
  0xf1   : > { %v319_v20 = vadd.f32 1.0, %v739_v19 }
  0xf3   : > { %742 = vrcp.f32 %v319_v20 }
  0xf4   : > { %v741_v21 = vpop.eup %740 }
  0xf5   : > { %v320_v22 = vadd.f32 1.0, %v741_v21 }
  0xf7   : > { %744 = vrcp.f32 %v320_v22 }
 0x100   : > { %v743_v23 = vpop.eup %742 }
 0x101   : > { %323 = vst [vmem:[%s933_s10] sm:$0xff] %v743_v23  ;;  %331 = sbr.rel (!%p904_p3) target bundleno = 301 (0x12d), region = 36 }
 0x104   : > { %v745_v24 = vpop.eup %744 }
 0x105   : > { %324 = vst [vmem:[%s933_s10 + $0x8] sm:$0xff] %v745_v24 }
 0x106   : > { %s995_s11 = smov (!%p334_p9, %s333_s11), 2 }
 0x107   : > { %s601_s23 = sshll.u32 %s995_s11, 7 }
 0x108   : > { %p604_p10 = scmp.eq.s32.totalorder %s601_s23, 0 }
 0x109   : > { %s950_s24 = sshrl.u32 (!%p604_p10), %s995_s11, 1 }
 0x10a   : > { %343 = sbr.rel (%p604_p10) target bundleno = 301 (0x12d), region = 40  ;;  %p605_p11 = scmp.le.s32.totalorder (!%p604_p10), %s950_s24, 0 }
 0x10f   : > { %513 = sbr.rel (%p605_p11) target bundleno = 284 (0x11c), region = 122  ;;  %s818_s14 = smov (!%p605_p11), %s944_s12  }
 0x110   : > { %s822_s20 = smov (!%p605_p11), %s933_s10   ;;  %s826_s25 = smov (!%p605_p11), 0  }
 0x111   : > { %s830_s26 = smov (!%p605_p11), 0  }
 0x114 LB: >> { %v408_v25 = vld [vmem:[%s824_s20] sm:$0xff]  ;;  %v410_v26 = vld [vmem:[%s824_s20 + $0x8] sm:$0xff]  ;;  %s412_s27 = sadd.s32 1, %s828_s25  ;;  %s402_s26 = sadd.s32 1, %s832_s26   ;;  %s832_s26 = sphi %s830_s26, %s402_s26   ;;  %s828_s25 = sphi %s826_s25, %s827_s25   ;;  %s824_s20 = sphi %s822_s20, %s417_s20   ;;  %s820_s14 = sphi %s818_s14, %s418_s14  }
 0x115   : >> { %409 = vst [vmem:[%s820_s14] sm:$0xff] %v408_v25  ;;  %411 = vst [vmem:[%s820_s14 + $0x8] sm:$0xff] %v410_v26  ;;  %p413_p12 = scmp.ge.s32.totalorder %s412_s27, %s950_s24  ;;  %p401_p13 = scmp.ge.s32.totalorder %s402_s26, %s950_s24 }
 0x117   : >> { %s997_s27 = smov (%p413_p12, %s412_s27), 0  ;;  %404 = sbr.rel (!%p401_p13) target bundleno = 276 (0x114), region = 128 }
 0x118   : >> { %s606_s28 = sshll.u32 %s997_s27, 4  ;;  %s827_s25 = smov %s997_s27  }
 0x119   : >> { %s417_s20 = scalar_lea.vmem %s933_s10, %s606_s28 [#allocation2]   ;;  %s418_s14 = scalar_lea.vmem %s944_s12, %s606_s28  }
 0x11c PF: > { %s960_s29 = sand.u32 1, %s995_s11   ;;  %s617_s30 = sshll.u32 %s950_s24, 4 }
 0x11d   : > { %s423_s4 = scalar_lea.vmem %s933_s10, %s617_s30 [#allocation2]   ;;  %s425_s5 = scalar_lea.vmem %s944_s12, %s617_s30  }
 0x11e   : > { %p611_p0 = scmp.le.s32.totalorder %s960_s29, 0 }
 0x11f   : > { %s834_s6 = smov (!%p611_p0), %s425_s5   ;;  %s838_s7 = smov (!%p611_p0), %s423_s4  }
 0x120   : > { %527 = sbr.rel (%p611_p0) target bundleno = 301 (0x12d), region = 133  ;;  %s842_s8 = smov (!%p611_p0), 0  }
 0x121   : > { %s846_s9 = smov (!%p611_p0), 0  }
 0x125 LB: >> { %v435_v27 = vld [vmem:[%s840_s7] sm:$0xff]  ;;  %s437_s11 = sadd.s32 1, %s844_s8  ;;  %s429_s9 = sadd.s32 1, %s848_s9   ;;  %s848_s9 = sphi %s846_s9, %s429_s9   ;;  %s844_s8 = sphi %s842_s8, %s843_s8   ;;  %s840_s7 = sphi %s838_s7, %s442_s7   ;;  %s836_s6 = sphi %s834_s6, %s443_s6  }
 0x126   : >> { %436 = vst [vmem:[%s836_s6] sm:$0xff] %v435_v27  ;;  %p438_p1 = scmp.ge.s32.totalorder %s437_s11, %s960_s29  ;;  %p428_p2 = scmp.ge.s32.totalorder %s429_s9, %s960_s29 }
 0x128   : >> { %s999_s11 = smov (%p438_p1, %s437_s11), 0  ;;  %431 = sbr.rel (!%p428_p2) target bundleno = 293 (0x125), region = 139 }
 0x129   : >> { %s612_s10 = sshll.u32 %s999_s11, 3  ;;  %s843_s8 = smov %s999_s11  }
 0x12a   : >> { %s442_s7 = scalar_lea.vmem %s423_s4, %s612_s10 [#allocation2]   ;;  %s443_s6 = scalar_lea.vmem %s425_s5, %s612_s10  }
 0x12d PF: > { %s13_s16 = sadd.s32 1, %s816_s16   ;;  %s988_s12 = smov %s804_s13 }
 0x12e   : > { %p10_p3 = scmp.ge.s32.totalorder %s13_s16, 4   ;;  %s989_s13 = smov %s913_s22 }
 0x12f   : > { %s990_s14 = smov %s812_s15  ;;  %s991_s15 = smov %s993_s18 }
 0x130   :  { %12 = sbr.rel (!%p10_p3) target bundleno = 3 (0x3), region = 150 }

</bundles_post_ra>
